<compile_context>
chip_gen: v5e
topology: v5e:2x2
jax: 0.10.0
libtpu: 0.0.40
codegen_flags: <defaults>
</compile_context>

<pallas_src>
import functools

import jax
import jax.numpy as jnp
from jax.experimental import pallas as pl
from jax.experimental.pallas import tpu as pltpu


def _round_up(x, m):
    return (x + m - 1) // m * m


def _pool_project_kernel(x_ref, w_ref, b_ref, o_ref, acc_ref, *,
                         inv_hw, hw, hw_chunk, mask_hw):
    # x_ref  : (tile_n, C, hw_chunk)  -- native NCHW layout, HW on lanes
    # w_ref  : (C, K_pad)             -- VMEM-resident across grid steps
    # b_ref  : (1, K_pad)             -- VMEM-resident across grid steps
    # o_ref  : (tile_n, K_pad)        -- lane-dense output tile
    # acc_ref: (tile_n, C) f32 scratch, pooled partial sums
    j = pl.program_id(1)

    @pl.when(j == 0)
    def _init():
        acc_ref[...] = jnp.zeros_like(acc_ref)

    x = x_ref[...].astype(jnp.float32)          # bf16 inputs upcast here
    if mask_hw:                                  # static: only traced if ragged
        lane = jax.lax.broadcasted_iota(jnp.int32, x.shape, 2)
        x = jnp.where(j * hw_chunk + lane < hw, x, 0.0)

    # Lane-axis (HW) reduction; the kernel is HBM-bound so XLU work is hidden.
    acc_ref[...] += jnp.sum(x, axis=-1)

    @pl.when(j == pl.num_programs(1) - 1)
    def _finalize():
        pooled = acc_ref[...] * inv_hw                               # (tile_n, C)
        logits = jnp.dot(pooled.astype(w_ref.dtype), w_ref[...],
                         preferred_element_type=jnp.float32)         # MXU
        o_ref[...] = logits + b_ref[...].astype(jnp.float32)


def pallas_classifier_head(x_nchw, w, b):
    """Global-average-pool + linear head. x_nchw: (N, C, H, W) -> (N, K)."""
    n, c, h, wd = x_nchw.shape
    hw = h * wd
    k = w.shape[1]
    k_pad = _round_up(k, 128)

    # Free relayout: contiguous NCHW -> (N, C, HW) is a bitcast (no HBM pass).
    x3 = x_nchw.reshape(n, c, hw)

    # Only the tiny weight/bias get padded to a lane-dense K; x is untouched.
    w_p = jnp.pad(w, ((0, 0), (0, k_pad - k)))
    b_p = jnp.pad(b.reshape(1, -1).astype(jnp.float32),
                  ((0, 0), (0, k_pad - k)))

    # ---- generation-aware VMEM budget -------------------------------------
    try:
        vmem_cap = int(getattr(pltpu.get_tpu_info(), "vmem_capacity_bytes",
                               64 << 20))
    except Exception:  # pragma: no cover - conservative fallback
        vmem_cap = 64 << 20
    vmem_limit = min(vmem_cap * 3 // 4, 96 << 20)   # 48 MiB on v7x, 96 on v5e/v6e

    x_isz = x3.dtype.itemsize
    w_isz = w_p.dtype.itemsize

    if n < 8:
        tile_n = n                                  # full-dim exemption
    else:
        tile_n = min(128, _round_up(n, 8))
    hw_chunk = min(_round_up(hw, 128), 8192)        # lane dim: multiple of 128

    def vmem_bytes(tn, hc):
        return (2 * tn * c * hc * x_isz             # double-buffered x stream
                + 2 * c * k_pad * w_isz             # resident w (fetched once)
                + 2 * k_pad * 4                     # resident bias
                + 2 * tn * k_pad * 4                # output tile
                + tn * c * 4)                       # acc scratch
    # NOTE: constant-index w/b could be single-buffered (pl.Buffered(1)) to
    # halve their footprint; we instead account for the default 2x buffers.

    budget = int(vmem_limit * 0.85)
    while vmem_bytes(tile_n, hw_chunk) > budget:
        if hw_chunk > 512:
            hw_chunk = max(128, (hw_chunk // 2) // 128 * 128)
        elif tile_n > 8:
            tile_n = max(8, _round_up(tile_n // 2, 8))
        elif hw_chunk > 128:
            hw_chunk = max(128, (hw_chunk // 2) // 128 * 128)
        else:
            break

    grid_i = pl.cdiv(n, tile_n)
    grid_j = pl.cdiv(hw, hw_chunk)
    n_out = grid_i * tile_n
    mask_hw = (hw % hw_chunk) != 0

    kernel = functools.partial(_pool_project_kernel, inv_hw=1.0 / float(hw),
                               hw=hw, hw_chunk=hw_chunk, mask_hw=mask_hw)

    flops = int(n * c * hw + 2 * n * c * k_pad)
    bytes_accessed = int(n * c * hw * x_isz + c * k_pad * w_isz
                         + k_pad * 4 + n_out * k_pad * 4)

    out = pl.pallas_call(
        kernel,
        out_shape=jax.ShapeDtypeStruct((n_out, k_pad), jnp.float32),
        grid_spec=pltpu.PrefetchScalarGridSpec(
            num_scalar_prefetch=0,
            grid=(grid_i, grid_j),
            in_specs=[
                pl.BlockSpec((tile_n, c, hw_chunk), lambda i, j: (i, 0, j)),
                pl.BlockSpec((c, k_pad), lambda i, j: (0, 0)),      # resident
                pl.BlockSpec((1, k_pad), lambda i, j: (0, 0)),      # resident
            ],
            out_specs=pl.BlockSpec((tile_n, k_pad), lambda i, j: (i, 0)),
            scratch_shapes=[pltpu.VMEM((tile_n, c), jnp.float32)],
        ),
        compiler_params=pltpu.CompilerParams(
            dimension_semantics=("parallel", "arbitrary"),
            vmem_limit_bytes=vmem_limit,
        ),
        cost_estimate=pl.CostEstimate(
            flops=flops, transcendentals=0, bytes_accessed=bytes_accessed),
    )(x3, w_p, b_p)

    return out[:n, :k]


class VModel:
    """JAX/Pallas port of the PyTorch `v_model` wrapper."""

    def __init__(self):
        self._model = None

    def forward(self, x):
        assert self._model is not None
        return self._model(x)

    __call__ = forward


def make_injected_model(num_channels, num_classes, key):
    """Deterministically-initialized stand-in `_model` (Pallas-backed)."""
    kw, kb = jax.random.split(key)
    w = jax.random.normal(kw, (num_channels, num_classes), dtype=jnp.float32) * 0.1
    b = jax.random.normal(kb, (1, num_classes), dtype=jnp.float32) * 0.01

    def model_fn(x):
        return pallas_classifier_head(x, w, b)

    return model_fn, (w, b)


if __name__ == "__main__":
    key = jax.random.PRNGKey(0)
    k_x, k_p = jax.random.split(key)

    N, C, H, W = 2, 4, 16, 16
    num_classes = 8
    x = jax.random.normal(k_x, (N, C, H, W), dtype=jnp.float32)

    model = VModel()
    model_fn, (w, b) = make_injected_model(C, num_classes, k_p)
    model._model = model_fn

    out = jax.block_until_ready(model(x))

    # Reference check in plain JAX.
    ref = x.reshape(N, C, H * W).mean(-1) @ w + b
    assert out.shape == (N, num_classes)
    assert jnp.allclose(out, ref, atol=1e-5, rtol=1e-5)

    print("KERNEL_OK")
</pallas_src>

<mosaic_0001>
module attributes {stable_mosaic.version = 11 : i64} {
  func.func @_pool_project_kernel(%arg0: i32, %arg1: i32, %arg2: memref<2x4x256xf32, #tpu.memory_space<vmem>>, %arg3: memref<4x128xf32, #tpu.memory_space<vmem>>, %arg4: memref<1x128xf32, #tpu.memory_space<vmem>>, %arg5: memref<2x128xf32, #tpu.memory_space<vmem>>, %arg6: memref<2x4xf32, #tpu.memory_space<vmem>>) attributes {dimension_semantics = [#tpu.dimension_semantics<parallel>, #tpu.dimension_semantics<arbitrary>], iteration_bounds = array<i64: 1, 1>, scalar_prefetch = 0 : i64, scratch_operands = 1 : i64, tpu.core_type = #tpu.core_type<tc>, window_params = [{transform_indices = @transform_0, window_bounds = array<i64: 2, 4, 256>}, {pipeline_mode = #tpu.pipeline_mode<synchronous>, transform_indices = @transform_1, window_bounds = array<i64: 4, 128>}, {pipeline_mode = #tpu.pipeline_mode<synchronous>, transform_indices = @transform_2, window_bounds = array<i64: 1, 128>}, {transform_indices = @transform_3, window_bounds = array<i64: 2, 128>}]} {
    %c0_i32 = arith.constant 0 : i32
    %0 = arith.cmpi eq, %arg1, %c0_i32 : i32
    %1 = arith.extui %0 : i1 to i32
    %c0_i32_0 = arith.constant 0 : i32
    %2 = arith.cmpi ne, %1, %c0_i32_0 : i32
    scf.if %2 {
      %cst_9 = arith.constant 0.000000e+00 : f32
      %11 = vector.broadcast %cst_9 : f32 to vector<2x4xf32>
      %c0_10 = arith.constant 0 : index
      %c0_11 = arith.constant 0 : index
      %12 = vector.load %arg6[%c0_10, %c0_11] : memref<2x4xf32, #tpu.memory_space<vmem>>, vector<2x4xf32>
      tpu.vector_store %arg6[%c0_10, %c0_11], %11 {strides = array<i32>} : memref<2x4xf32, #tpu.memory_space<vmem>>, vector<2x4xf32>,
    } else {
    }
    %c0 = arith.constant 0 : index
    %c0_1 = arith.constant 0 : index
    %c0_2 = arith.constant 0 : index
    %3 = vector.load %arg2[%c0, %c0_1, %c0_2] : memref<2x4x256xf32, #tpu.memory_space<vmem>>, vector<2x4x256xf32>
    %c0_3 = arith.constant 0 : index
    %c0_4 = arith.constant 0 : index
    %4 = vector.load %arg6[%c0_3, %c0_4] : memref<2x4xf32, #tpu.memory_space<vmem>>, vector<2x4xf32>
    %cst = arith.constant dense<0.000000e+00> : vector<2x4xf32>
    %5 = vector.multi_reduction <add>, %3, %cst [2] : vector<2x4x256xf32> to vector<2x4xf32>
    %6 = arith.addf %4, %5 : vector<2x4xf32>
    %c0_5 = arith.constant 0 : index
    %c0_6 = arith.constant 0 : index
    %7 = vector.load %arg6[%c0_5, %c0_6] : memref<2x4xf32, #tpu.memory_space<vmem>>, vector<2x4xf32>
    tpu.vector_store %arg6[%c0_5, %c0_6], %6 {strides = array<i32>} : memref<2x4xf32, #tpu.memory_space<vmem>>, vector<2x4xf32>,
    %c0_i32_7 = arith.constant 0 : i32
    %8 = arith.cmpi eq, %arg1, %c0_i32_7 : i32
    %9 = arith.extui %8 : i1 to i32
    %c0_i32_8 = arith.constant 0 : i32
    %10 = arith.cmpi ne, %9, %c0_i32_8 : i32
    scf.if %10 {
      %c0_9 = arith.constant 0 : index
      %c0_10 = arith.constant 0 : index
      %11 = vector.load %arg6[%c0_9, %c0_10] : memref<2x4xf32, #tpu.memory_space<vmem>>, vector<2x4xf32>
      %cst_11 = arith.constant 3.906250e-03 : f32
      %12 = vector.broadcast %cst_11 : f32 to vector<2x4xf32>
      %13 = arith.mulf %11, %12 : vector<2x4xf32>
      %c0_12 = arith.constant 0 : index
      %c0_13 = arith.constant 0 : index
      %14 = vector.load %arg3[%c0_12, %c0_13] : memref<4x128xf32, #tpu.memory_space<vmem>>, vector<4x128xf32>
      %cst_14 = arith.constant dense<0.000000e+00> : vector<2x128xf32>
      %15 = tpu.matmul %13, %14, %cst_14 {dimension_numbers = #tpu.dot_dimension_numbers<[1], [0], [0], [1], [0, 0, 1, 1], [], []>} : vector<2x4xf32>, vector<4x128xf32>, vector<2x128xf32> -> vector<2x128xf32>
      %c0_15 = arith.constant 0 : index
      %c0_16 = arith.constant 0 : index
      %16 = vector.load %arg4[%c0_15, %c0_16] : memref<1x128xf32, #tpu.memory_space<vmem>>, vector<1x128xf32>
      %17 = vector.broadcast %16 : vector<1x128xf32> to vector<2x128xf32>
      %18 = arith.addf %15, %17 : vector<2x128xf32>
      %c0_17 = arith.constant 0 : index
      %c0_18 = arith.constant 0 : index
      %19 = vector.load %arg5[%c0_17, %c0_18] : memref<2x128xf32, #tpu.memory_space<vmem>>, vector<2x128xf32>
      tpu.vector_store %arg5[%c0_17, %c0_18], %18 {strides = array<i32>} : memref<2x128xf32, #tpu.memory_space<vmem>>, vector<2x128xf32>,
    } else {
    }
    return
  }
  func.func @transform_0(%arg0: i32, %arg1: i32) -> (i32, i32, i32) {
    %c0_i32 = arith.constant 0 : i32
    %c0_i32_0 = arith.constant 0 : i32
    return %arg0, %c0_i32, %arg1 : i32, i32, i32
  }
  func.func @transform_1(%arg0: i32, %arg1: i32) -> (i32, i32) {
    %c0_i32 = arith.constant 0 : i32
    %c0_i32_0 = arith.constant 0 : i32
    %c0_i32_1 = arith.constant 0 : i32
    return %c0_i32, %c0_i32_0 : i32, i32
  }
  func.func @transform_2(%arg0: i32, %arg1: i32) -> (i32, i32) {
    %c0_i32 = arith.constant 0 : i32
    %c0_i32_0 = arith.constant 0 : i32
    %c0_i32_1 = arith.constant 0 : i32
    return %c0_i32, %c0_i32_0 : i32, i32
  }
  func.func @transform_3(%arg0: i32, %arg1: i32) -> (i32, i32) {
    %c0_i32 = arith.constant 0 : i32
    %c0_i32_0 = arith.constant 0 : i32
    return %arg0, %c0_i32 : i32, i32
  }
}

</mosaic_0001>

<bundles_post_ra>
// kernel: tpu_custom_call.1
= control target key start
LH: loop header
LB: loop body
LE: loop exit
PB: predicated region body
PF: predicated region fallthrough
CT: control target
= control target key end

     0   :  { %8 = vsyncpa [#allocation4], 0  ;;  %s276_s0 = inlined_call_operand.hbm [shape: f32[2,4,256], index: 0, kind: input, shape index: {}]   ;;  %s277_s1 = inlined_call_operand.hbm [shape: f32[4,128], index: 1, kind: input, shape index: {}]   ;;  %s278_s2 = inlined_call_operand.vmem [shape: f32[1,128], index: 2, kind: input, shape index: {}]   ;;  %s279_s3 = inlined_call_operand.hbm [shape: f32[2,128], index: 3, kind: output, shape index: {}]  }
   0x1   :  { %9 = vsyncpa [#allocation7], 0 }
   0x2   :  { %10 = vsyncpa [#allocation5], 0  ;;  %s15_s14 = sshll.u32 %s276_s0, 4  ;;  %s233_s15 = smov [#allocation3]   ;;  %s16_s14 = int_to_ptr.hbm [resolvable:$true] %s15_s14 }
   0x3   :  { %s17_s16 = sshll.u32 %s233_s15, 4  ;;  %s29_s19 = sshll.u32 %s277_s1, 4  ;;  %s18_s16 = int_to_ptr.vmem [resolvable:$true] %s17_s16  ;;  %s30_s19 = int_to_ptr.hbm [resolvable:$true] %s29_s19 }
   0x4   :  { %s234_s20 = smov 128   ;;  %s235_s21 = smov 8  }
   0x5   :  { %23 = dma.hbm_to_vmem [thread:$0]  %s16_s14, 256, %s18_s16, [#allocation4], %s234_s20, %s234_s20, %s235_s21  }
   0x6   :  { %s236_s22 = smov [#allocation6]  }
   0x7   :  { %s31_s23 = sshll.u32 %s236_s22, 4  ;;  %s32_s23 = int_to_ptr.vmem [resolvable:$true] %s31_s23 }
   0x8   :  { %34 = dma.hbm_to_vmem [thread:$0]  %s30_s19, 64, %s32_s23, [#allocation7]  }
   0x9   :  { %227 = dma.done.wait [#allocation4], 256  }
   0xa   :  { %228 = vsyncadd [#allocation4], 4294967040 }
   0xb   :  { %229 = dma.done.wait [#allocation7], 64  }
   0xc   :  { %230 = vsyncadd [#allocation7], 4294967232  ;;  %v51_v0 = vld [vmem:[#allocation3] sm:$0xff]  ;;  %v52_v1 = vld [vmem:[#allocation3 + $0x8] sm:$0xff]  ;;  %vm67_vm0 = vcmask 1043456   ;;  %vm49_vm1 = vcmask 25600   ;;  %v80_v15 = vlaneseq }
   0xd   :  { %56 = vst [vmem:[#allocation1] ss:$2 sm:$0xff] %v51_v0  ;;  %v237_v12 = vmov 0.0   ;;  %v95_v13 = vld [vmem:[#allocation6] sm:$0xf]  ;;  %vm84_vm2 = vcmask 1041409  }
   0xe   :  { %60 = vst [vmem:[#allocation1 + $0x10] ss:$2 sm:$0xff] %v52_v1  ;;  %146 = vmatpush.msk.msra.mxu0 %vm67_vm0, %v95_v13  ;;  %v81_v16 = vand.u32 127, %v80_v15  ;;  %vm100_vm3 = vcmask 31744   ;;  %v154_v25 = vld [vmem:[%s278_s2] ss:$0 sm:$0xff] }
   0xf   :  { %50 = vst.msk [vmem:[#allocation2] sm:$0x3] %vm49_vm1, %v237_v12  ;;  %s238_s24 = smov [#allocation8]   ;;  %s135_s28 = sshll.u32 %s279_s3, 4  ;;  %s136_s28 = int_to_ptr.hbm [resolvable:$true] %s135_s28 }
  0x10   :  { %s133_s25 = sshll.u32 %s238_s24, 4  ;;  %s134_s25 = int_to_ptr.vmem [resolvable:$true] %s133_s25 }
  0x14   :  { %v57_v2 = vld.sshfl [vmem:[#allocation1] sm:$0xff pattern:$0x75316420]  ;;  %v58_v3 = vld.sshfl [vmem:[#allocation1 + $0x8] sm:$0xff pattern:$0x75316420] }
  0x15   :  { %v68_v4 = vsel %vm67_vm0, %v57_v2, 0.0  ;;  %v69_v5 = vsel %vm67_vm0, %v58_v3, 0.0  ;;  %v61_v7 = vld.sshfl [vmem:[#allocation1 + $0x10] sm:$0xff pattern:$0x75316420] }
  0x16   :  { %v70_v6 = vadd.f32 %v69_v5, %v68_v4  ;;  %v62_v8 = vld.sshfl [vmem:[#allocation1 + $0x18] sm:$0xff pattern:$0x75316420]  ;;  %v73_v9 = vsel %vm67_vm0, %v61_v7, 0.0  ;;  %v53_v19 = vld [vmem:[#allocation2] sm:$0x3] }
  0x17   :  { %v74_v10 = vsel %vm67_vm0, %v62_v8, 0.0 }
  0x18   :  { %71 = vadd.xlane.f32.xlu0 %v70_v6  ;;  %v75_v11 = vadd.f32 %v74_v10, %v73_v9 }
  0x20   :  { %76 = vadd.xlane.f32.xlu0 %v75_v11 }
  0x8b   :  { %v72_v14 = vpop.xlane.xlu0 %71 }
  0x8c   :  { %v82_v18 = vperm.slane %v72_v14, %v81_v16 }
  0x93   :  { %v77_v17 = vpop.xlane.xlu0 %76 }
  0x94   :  { %v83_v20 = vperm.slane %v77_v17, %v81_v16 }
  0x96   :  { %v85_v21 = vsel %vm84_vm2, %v83_v20, %v82_v18 }
  0x97   :  { %v87_v22 = vadd.f32 %v85_v21, %v53_v19 }
  0x99   :  { %89 = vst.msk [vmem:[#allocation2] sm:$0x3] %vm49_vm1, %v87_v22 }
  0xa0   :  { %v93_v23 = vld [vmem:[#allocation2] sm:$0x3] }
  0xa1   :  { %v94_v24 = vmul.f32 0.00390625, %v93_v23 }
  0xa3   :  { %147 = vmatmul.msk.f32.vlgmr.msra.gmra.mxu0 %vm100_vm3, %v94_v24 }
 0x120   :  { %v124_v26 = vpop.f32.mrf.mxu0 }
 0x121   :  { %v125_v27 = vadd.f32 %v154_v25, %v124_v26 }
 0x123   :  { %127 = vst [vmem:[#allocation8] sm:$0x3] %v125_v27 }
 0x124   :  { %138 = dma.vmem_to_hbm [thread:$0]  %s134_s25, 32, %s136_s28, [#allocation5]  }
 0x125   :  { %231 = dma.done.wait [#allocation5], 32  }
 0x126   :  { %232 = vsyncadd [#allocation5], 4294967264 }
 0x127   :  { %143 = vsyncpa [#allocation4], 1 }
 0x128   :  { %144 = vsyncpa [#allocation7], 1 }
 0x129   :  { %145 = vsyncpa [#allocation5], 1 }

</bundles_post_ra>
